<compile_context>
chip_gen: v7x
topology: tpu7x:2x2x1
jax: 0.10.0
libtpu: 0.0.40
codegen_flags: <defaults>
</compile_context>

<pallas_src>
import math

import jax
import jax.numpy as jnp
from jax.experimental import pallas as pl
from jax.experimental.pallas import tpu as pltpu

# ----------------------------- problem config ------------------------------
N, C_IN, H, W = 2, 4, 16, 16          # input  (NCHW, torch layout)
C_OUT, KH, KW = 8, 3, 3               # Conv2d(4, 8, kernel_size=3, padding=1)
PAD = 1


def _make_kernel(nb, c_in, h, w_sp, c_out, kh, kw, pad):
    """Fused spectral-norm + conv2d kernel; whole batch in one grid step."""
    hw = h * w_sp
    cols = nb * hw

    def kernel(x_ref, w_ref, u_ref, b_ref, y_ref, u_out_ref):
        # x_ref    : (N, C, H*W)     NCHW images, spatial dims flattened
        # w_ref    : (O, KH*KW*C)    ORIGINAL weight, tap-major columns
        # u_ref    : (O, 1)          stored power-iteration vector
        # b_ref    : (O, 1)          bias
        # y_ref    : (N, O, H*W)     conv output (lane-dense 256-wide stores)
        # u_out_ref: (O, 1)          updated power-iteration vector u'

        # ---- spectral norm: one power-iteration step, sigma = ||W v|| ------
        # (sigma and W v are invariant under the tap-major column permutation)
        wm = w_ref[...]                                         # (O, D)
        u = u_ref[...]                                          # (O, 1)
        wu = jnp.sum(wm * u, axis=0, keepdims=True)             # (1, D) = u^T W
        v = wu * jax.lax.rsqrt(jnp.sum(wu * wu, axis=1, keepdims=True))
        wv = jnp.sum(wm * v, axis=1, keepdims=True)             # (O, 1) = W v
        inv_sigma = jax.lax.rsqrt(jnp.sum(wv * wv, axis=0, keepdims=True))
        u_out_ref[...] = wv * inv_sigma                         # u' = Wv/||Wv||
        w_s = wm * inv_sigma                                    # (O, D) = W/sigma

        # ---- fold batch into the lane axis: (C, N*H*W) ----------------------
        if nb == 1:
            xcat = x_ref[0]
        else:
            xcat = jnp.concatenate([x_ref[i] for i in range(nb)], axis=-1)

        # ---- hoisted edge-validity masks (one per distinct dh / dw) ---------
        lane = jax.lax.broadcasted_iota(jnp.int32, (1, cols), 1)
        q = lane & (hw - 1) if (hw & (hw - 1)) == 0 else lane % hw
        if (w_sp & (w_sp - 1)) == 0:
            wpos = q & (w_sp - 1)
            hpos = q >> (w_sp.bit_length() - 1)
        else:
            wpos = q % w_sp
            hpos = q // w_sp
        h_mask = {dh: (hpos >= -dh) if dh < 0 else (hpos < h - dh)
                  for dh in range(-pad, kh - pad) if dh != 0}
        w_mask = {dw: (wpos >= -dw) if dw < 0 else (wpos < w_sp - dw)
                  for dw in range(-pad, kw - pad) if dw != 0}

        # ---- im2col: stack 9 shifted + masked windows -> (KH*KW*C, cols) ----
        rows = []
        for ikh in range(kh):
            for ikw in range(kw):
                dh, dw = ikh - pad, ikw - pad
                off = dh * w_sp + dw
                win = xcat if off == 0 else jnp.roll(xcat, -off, axis=-1)
                vm = h_mask.get(dh)
                mw = w_mask.get(dw)
                if mw is not None:
                    vm = mw if vm is None else jnp.logical_and(vm, mw)
                if vm is not None:
                    win = jnp.where(vm, win, 0.0)    # mask (C, cols) inputs
                rows.append(win)
        patch = rows[0] if len(rows) == 1 else jnp.concatenate(rows, axis=0)

        # ---- one (O, 36) x (36, N*HW) MXU dot + bias epilogue ---------------
        acc = jnp.dot(w_s, patch, preferred_element_type=jnp.float32)
        y = acc + b_ref[...]                                    # (O, cols)
        for i in range(nb):
            y_ref[i] = y[:, i * hw:(i + 1) * hw].astype(y_ref.dtype)

    return kernel


def spectral_norm_conv2d_forward(x_nchw, w_orig_oihw, u, bias, padding):
    """Returns (conv output in NCHW, updated power-iteration vector u')."""
    nb, c_in, h, w_sp = x_nchw.shape
    c_out, _, kh, kw = w_orig_oihw.shape
    hw = h * w_sp
    d = kh * kw * c_in

    x_flat = x_nchw.reshape(nb, c_in, hw)          # free (contiguous) reshape
    # Tap-major flattening of the ORIGINAL weight: column (kh*KW + kw)*C + c.
    w_tap = jnp.transpose(w_orig_oihw, (0, 2, 3, 1)).reshape(c_out, d)  # tiny
    b_col = bias.reshape(c_out, 1)

    kernel = _make_kernel(nb, c_in, h, w_sp, c_out, kh, kw, padding)
    y_flat, u_new = pl.pallas_call(
        kernel,
        out_shape=(
            jax.ShapeDtypeStruct((nb, c_out, hw), x_nchw.dtype),
            jax.ShapeDtypeStruct((c_out, 1), jnp.float32),
        ),
        grid=(1,),
        in_specs=[
            pl.BlockSpec((nb, c_in, hw), lambda i: (0, 0, 0)),
            pl.BlockSpec((c_out, d), lambda i: (0, 0)),
            pl.BlockSpec((c_out, 1), lambda i: (0, 0)),
            pl.BlockSpec((c_out, 1), lambda i: (0, 0)),
        ],
        out_specs=(
            pl.BlockSpec((nb, c_out, hw), lambda i: (0, 0, 0)),
            pl.BlockSpec((c_out, 1), lambda i: (0, 0)),
        ),
        compiler_params=pltpu.CompilerParams(
            dimension_semantics=("arbitrary",)),
    )(x_flat, w_tap, u, b_col)

    return y_flat.reshape(nb, c_out, h, w_sp), u_new


if __name__ == "__main__":
    key = jax.random.PRNGKey(0)
    k_w, k_u, k_x = jax.random.split(key, 3)

    # kaiming_normal on conv.weight (fan_in, relu gain): std = sqrt(2/fan_in)
    fan_in = C_IN * KH * KW
    w_orig = jax.random.normal(k_w, (C_OUT, C_IN, KH, KW), jnp.float32) \
        * math.sqrt(2.0 / fan_in)
    u0 = jax.random.normal(k_u, (C_OUT, 1), jnp.float32) * 0.1   # randn(O,1)*0.1
    bias = jnp.zeros((C_OUT,), jnp.float32)                      # bias.zero_()
    x = jax.random.normal(k_x, (N, C_IN, H, W), jnp.float32)

    fwd = jax.jit(spectral_norm_conv2d_forward, static_argnums=(4,))
    out, u_new = fwd(x, w_orig, u0, bias, PAD)
    out = jax.block_until_ready(out)

    # ---------------- pure-JAX reference (mirrors the torch module) ---------
    w_mat = w_orig.reshape(C_OUT, -1)
    v = w_mat.T @ u0
    v = v / jnp.linalg.norm(v)
    u_next = w_mat @ v
    u_next = u_next / jnp.linalg.norm(u_next)
    sigma = (u_next.T @ w_mat @ v)[0, 0]
    w_sn = (w_mat / sigma).reshape(w_orig.shape)
    ref = jax.lax.conv_general_dilated(
        x, w_sn, window_strides=(1, 1), padding=((PAD, PAD), (PAD, PAD)),
        dimension_numbers=("NCHW", "OIHW", "NCHW")) + bias.reshape(1, -1, 1, 1)

    assert out.shape == (N, C_OUT, H, W)
    assert jnp.allclose(out, ref, rtol=1e-4, atol=1e-4)
    assert jnp.allclose(u_new, u_next, rtol=1e-4, atol=1e-4)
    print("KERNEL_OK")
</pallas_src>

<mosaic_0001>
module attributes {stable_mosaic.version = 11 : i64} {
  func.func @kernel(%arg0: i32, %arg1: memref<2x4x256xf32, #tpu.memory_space<vmem>>, %arg2: memref<8x36xf32, #tpu.memory_space<vmem>>, %arg3: memref<8x1xf32, #tpu.memory_space<vmem>>, %arg4: memref<8x1xf32, #tpu.memory_space<vmem>>, %arg5: memref<2x8x256xf32, #tpu.memory_space<vmem>>, %arg6: memref<8x1xf32, #tpu.memory_space<vmem>>) attributes {dimension_semantics = [#tpu.dimension_semantics<arbitrary>], iteration_bounds = array<i64: 1>, scalar_prefetch = 0 : i64, scratch_operands = 0 : i64, tpu.core_type = #tpu.core_type<tc>, window_params = [{pipeline_mode = #tpu.pipeline_mode<synchronous>, transform_indices = @transform_0, window_bounds = array<i64: 2, 4, 256>}, {pipeline_mode = #tpu.pipeline_mode<synchronous>, transform_indices = @transform_1, window_bounds = array<i64: 8, 36>}, {pipeline_mode = #tpu.pipeline_mode<synchronous>, transform_indices = @transform_2, window_bounds = array<i64: 8, 1>}, {pipeline_mode = #tpu.pipeline_mode<synchronous>, transform_indices = @transform_3, window_bounds = array<i64: 8, 1>}, {pipeline_mode = #tpu.pipeline_mode<synchronous>, transform_indices = @transform_4, window_bounds = array<i64: 2, 8, 256>}, {pipeline_mode = #tpu.pipeline_mode<synchronous>, transform_indices = @transform_5, window_bounds = array<i64: 8, 1>}]} {
    %c0 = arith.constant 0 : index
    %c0_0 = arith.constant 0 : index
    %0 = vector.load %arg2[%c0, %c0_0] : memref<8x36xf32, #tpu.memory_space<vmem>>, vector<8x36xf32>
    %c0_1 = arith.constant 0 : index
    %c0_2 = arith.constant 0 : index
    %1 = vector.load %arg3[%c0_1, %c0_2] : memref<8x1xf32, #tpu.memory_space<vmem>>, vector<8x1xf32>
    %2 = vector.broadcast %1 : vector<8x1xf32> to vector<8x36xf32>
    %3 = arith.mulf %0, %2 : vector<8x36xf32>
    %cst = arith.constant dense<0.000000e+00> : vector<36xf32>
    %4 = vector.multi_reduction <add>, %3, %cst [0] : vector<8x36xf32> to vector<36xf32>
    %5 = vector.shape_cast %4 : vector<36xf32> to vector<1x36xf32>
    %6 = arith.mulf %5, %5 : vector<1x36xf32>
    %cst_3 = arith.constant dense<0.000000e+00> : vector<1xf32>
    %7 = vector.multi_reduction <add>, %6, %cst_3 [1] : vector<1x36xf32> to vector<1xf32>
    %8 = vector.shape_cast %7 : vector<1xf32> to vector<1x1xf32>
    %9 = math.rsqrt %8 : vector<1x1xf32>
    %10 = vector.broadcast %9 : vector<1x1xf32> to vector<1x36xf32>
    %11 = arith.mulf %5, %10 : vector<1x36xf32>
    %12 = vector.broadcast %11 : vector<1x36xf32> to vector<8x36xf32>
    %13 = arith.mulf %0, %12 : vector<8x36xf32>
    %cst_4 = arith.constant dense<0.000000e+00> : vector<8xf32>
    %14 = vector.multi_reduction <add>, %13, %cst_4 [1] : vector<8x36xf32> to vector<8xf32>
    %15 = vector.shape_cast %14 : vector<8xf32> to vector<8x1xf32>
    %16 = arith.mulf %15, %15 : vector<8x1xf32>
    %cst_5 = arith.constant dense<0.000000e+00> : vector<1xf32>
    %17 = vector.multi_reduction <add>, %16, %cst_5 [0] : vector<8x1xf32> to vector<1xf32>
    %18 = vector.shape_cast %17 : vector<1xf32> to vector<1x1xf32>
    %19 = math.rsqrt %18 : vector<1x1xf32>
    %20 = vector.broadcast %19 : vector<1x1xf32> to vector<8x1xf32>
    %21 = arith.mulf %15, %20 : vector<8x1xf32>
    %c0_6 = arith.constant 0 : index
    %c0_7 = arith.constant 0 : index
    %22 = vector.load %arg6[%c0_6, %c0_7] : memref<8x1xf32, #tpu.memory_space<vmem>>, vector<8x1xf32>
    tpu.vector_store %arg6[%c0_6, %c0_7], %21 {strides = array<i32>} : memref<8x1xf32, #tpu.memory_space<vmem>>, vector<8x1xf32>,
    %23 = vector.broadcast %19 : vector<1x1xf32> to vector<8x36xf32>
    %24 = arith.mulf %0, %23 : vector<8x36xf32>
    %c0_8 = arith.constant 0 : index
    %c0_9 = arith.constant 0 : index
    %c0_10 = arith.constant 0 : index
    %25 = vector.load %arg1[%c0_8, %c0_9, %c0_10] : memref<2x4x256xf32, #tpu.memory_space<vmem>>, vector<1x4x256xf32>
    %26 = vector.shape_cast %25 : vector<1x4x256xf32> to vector<4x256xf32>
    %c1 = arith.constant 1 : index
    %c0_11 = arith.constant 0 : index
    %c0_12 = arith.constant 0 : index
    %27 = vector.load %arg1[%c1, %c0_11, %c0_12] : memref<2x4x256xf32, #tpu.memory_space<vmem>>, vector<1x4x256xf32>
    %28 = vector.shape_cast %27 : vector<1x4x256xf32> to vector<4x256xf32>
    %29 = tpu.concatenate %26, %28 in 1 : vector<4x256xf32>, vector<4x256xf32> -> vector<4x512xf32>
    %30 = tpu.iota {dimensions = array<i32: 1>} : vector<1x512xi32>
    %c255_i32 = arith.constant 255 : i32
    %31 = vector.broadcast %c255_i32 : i32 to vector<1x512xi32>
    %32 = arith.andi %30, %31 : vector<1x512xi32>
    %c15_i32 = arith.constant 15 : i32
    %33 = vector.broadcast %c15_i32 : i32 to vector<1x512xi32>
    %34 = arith.andi %32, %33 : vector<1x512xi32>
    %c4_i32 = arith.constant 4 : i32
    %35 = vector.broadcast %c4_i32 : i32 to vector<1x512xi32>
    %36 = arith.shrsi %32, %35 : vector<1x512xi32>
    %c1_i32 = arith.constant 1 : i32
    %37 = vector.broadcast %c1_i32 : i32 to vector<1x512xi32>
    %38 = arith.cmpi sge, %36, %37 : vector<1x512xi32>
    %c15_i32_13 = arith.constant 15 : i32
    %39 = vector.broadcast %c15_i32_13 : i32 to vector<1x512xi32>
    %40 = arith.cmpi slt, %36, %39 : vector<1x512xi32>
    %c1_i32_14 = arith.constant 1 : i32
    %41 = vector.broadcast %c1_i32_14 : i32 to vector<1x512xi32>
    %42 = arith.cmpi sge, %34, %41 : vector<1x512xi32>
    %c15_i32_15 = arith.constant 15 : i32
    %43 = vector.broadcast %c15_i32_15 : i32 to vector<1x512xi32>
    %44 = arith.cmpi slt, %34, %43 : vector<1x512xi32>
    %45 = vector.extract_strided_slice %29 {offsets = [0, 495], sizes = [4, 17], strides = [1, 1]} : vector<4x512xf32> to vector<4x17xf32>
    %46 = vector.extract_strided_slice %29 {offsets = [0, 0], sizes = [4, 495], strides = [1, 1]} : vector<4x512xf32> to vector<4x495xf32>
    %47 = tpu.concatenate %45, %46 in 1 : vector<4x17xf32>, vector<4x495xf32> -> vector<4x512xf32>
    %48 = arith.andi %38, %42 : vector<1x512xi1>
    %cst_16 = arith.constant 0.000000e+00 : f32
    %49 = vector.shape_cast %48 : vector<1x512xi1> to vector<1x512xi1>
    %50 = vector.broadcast %49 : vector<1x512xi1> to vector<4x512xi1>
    %51 = vector.broadcast %cst_16 : f32 to vector<4x512xf32>
    %52 = arith.select %50, %47, %51 : vector<4x512xi1>, vector<4x512xf32>
    %53 = vector.extract_strided_slice %29 {offsets = [0, 496], sizes = [4, 16], strides = [1, 1]} : vector<4x512xf32> to vector<4x16xf32>
    %54 = vector.extract_strided_slice %29 {offsets = [0, 0], sizes = [4, 496], strides = [1, 1]} : vector<4x512xf32> to vector<4x496xf32>
    %55 = tpu.concatenate %53, %54 in 1 : vector<4x16xf32>, vector<4x496xf32> -> vector<4x512xf32>
    %cst_17 = arith.constant 0.000000e+00 : f32
    %56 = vector.shape_cast %38 : vector<1x512xi1> to vector<1x512xi1>
    %57 = vector.broadcast %56 : vector<1x512xi1> to vector<4x512xi1>
    %58 = vector.broadcast %cst_17 : f32 to vector<4x512xf32>
    %59 = arith.select %57, %55, %58 : vector<4x512xi1>, vector<4x512xf32>
    %60 = vector.extract_strided_slice %29 {offsets = [0, 497], sizes = [4, 15], strides = [1, 1]} : vector<4x512xf32> to vector<4x15xf32>
    %61 = vector.extract_strided_slice %29 {offsets = [0, 0], sizes = [4, 497], strides = [1, 1]} : vector<4x512xf32> to vector<4x497xf32>
    %62 = tpu.concatenate %60, %61 in 1 : vector<4x15xf32>, vector<4x497xf32> -> vector<4x512xf32>
    %63 = arith.andi %38, %44 : vector<1x512xi1>
    %cst_18 = arith.constant 0.000000e+00 : f32
    %64 = vector.shape_cast %63 : vector<1x512xi1> to vector<1x512xi1>
    %65 = vector.broadcast %64 : vector<1x512xi1> to vector<4x512xi1>
    %66 = vector.broadcast %cst_18 : f32 to vector<4x512xf32>
    %67 = arith.select %65, %62, %66 : vector<4x512xi1>, vector<4x512xf32>
    %68 = vector.extract_strided_slice %29 {offsets = [0, 511], sizes = [4, 1], strides = [1, 1]} : vector<4x512xf32> to vector<4x1xf32>
    %69 = vector.extract_strided_slice %29 {offsets = [0, 0], sizes = [4, 511], strides = [1, 1]} : vector<4x512xf32> to vector<4x511xf32>
    %70 = tpu.concatenate %68, %69 in 1 : vector<4x1xf32>, vector<4x511xf32> -> vector<4x512xf32>
    %cst_19 = arith.constant 0.000000e+00 : f32
    %71 = vector.shape_cast %42 : vector<1x512xi1> to vector<1x512xi1>
    %72 = vector.broadcast %71 : vector<1x512xi1> to vector<4x512xi1>
    %73 = vector.broadcast %cst_19 : f32 to vector<4x512xf32>
    %74 = arith.select %72, %70, %73 : vector<4x512xi1>, vector<4x512xf32>
    %75 = vector.extract_strided_slice %29 {offsets = [0, 1], sizes = [4, 511], strides = [1, 1]} : vector<4x512xf32> to vector<4x511xf32>
    %76 = vector.extract_strided_slice %29 {offsets = [0, 0], sizes = [4, 1], strides = [1, 1]} : vector<4x512xf32> to vector<4x1xf32>
    %77 = tpu.concatenate %75, %76 in 1 : vector<4x511xf32>, vector<4x1xf32> -> vector<4x512xf32>
    %cst_20 = arith.constant 0.000000e+00 : f32
    %78 = vector.shape_cast %44 : vector<1x512xi1> to vector<1x512xi1>
    %79 = vector.broadcast %78 : vector<1x512xi1> to vector<4x512xi1>
    %80 = vector.broadcast %cst_20 : f32 to vector<4x512xf32>
    %81 = arith.select %79, %77, %80 : vector<4x512xi1>, vector<4x512xf32>
    %82 = vector.extract_strided_slice %29 {offsets = [0, 15], sizes = [4, 497], strides = [1, 1]} : vector<4x512xf32> to vector<4x497xf32>
    %83 = vector.extract_strided_slice %29 {offsets = [0, 0], sizes = [4, 15], strides = [1, 1]} : vector<4x512xf32> to vector<4x15xf32>
    %84 = tpu.concatenate %82, %83 in 1 : vector<4x497xf32>, vector<4x15xf32> -> vector<4x512xf32>
    %85 = arith.andi %40, %42 : vector<1x512xi1>
    %cst_21 = arith.constant 0.000000e+00 : f32
    %86 = vector.shape_cast %85 : vector<1x512xi1> to vector<1x512xi1>
    %87 = vector.broadcast %86 : vector<1x512xi1> to vector<4x512xi1>
    %88 = vector.broadcast %cst_21 : f32 to vector<4x512xf32>
    %89 = arith.select %87, %84, %88 : vector<4x512xi1>, vector<4x512xf32>
    %90 = vector.extract_strided_slice %29 {offsets = [0, 16], sizes = [4, 496], strides = [1, 1]} : vector<4x512xf32> to vector<4x496xf32>
    %91 = vector.extract_strided_slice %29 {offsets = [0, 0], sizes = [4, 16], strides = [1, 1]} : vector<4x512xf32> to vector<4x16xf32>
    %92 = tpu.concatenate %90, %91 in 1 : vector<4x496xf32>, vector<4x16xf32> -> vector<4x512xf32>
    %cst_22 = arith.constant 0.000000e+00 : f32
    %93 = vector.shape_cast %40 : vector<1x512xi1> to vector<1x512xi1>
    %94 = vector.broadcast %93 : vector<1x512xi1> to vector<4x512xi1>
    %95 = vector.broadcast %cst_22 : f32 to vector<4x512xf32>
    %96 = arith.select %94, %92, %95 : vector<4x512xi1>, vector<4x512xf32>
    %97 = vector.extract_strided_slice %29 {offsets = [0, 17], sizes = [4, 495], strides = [1, 1]} : vector<4x512xf32> to vector<4x495xf32>
    %98 = vector.extract_strided_slice %29 {offsets = [0, 0], sizes = [4, 17], strides = [1, 1]} : vector<4x512xf32> to vector<4x17xf32>
    %99 = tpu.concatenate %97, %98 in 1 : vector<4x495xf32>, vector<4x17xf32> -> vector<4x512xf32>
    %100 = arith.andi %40, %44 : vector<1x512xi1>
    %cst_23 = arith.constant 0.000000e+00 : f32
    %101 = vector.shape_cast %100 : vector<1x512xi1> to vector<1x512xi1>
    %102 = vector.broadcast %101 : vector<1x512xi1> to vector<4x512xi1>
    %103 = vector.broadcast %cst_23 : f32 to vector<4x512xf32>
    %104 = arith.select %102, %99, %103 : vector<4x512xi1>, vector<4x512xf32>
    %105 = tpu.concatenate %52, %59, %67, %74, %29, %81, %89, %96, %104 in 0 : vector<4x512xf32>, vector<4x512xf32>, vector<4x512xf32>, vector<4x512xf32>, vector<4x512xf32>, vector<4x512xf32>, vector<4x512xf32>, vector<4x512xf32>, vector<4x512xf32> -> vector<36x512xf32>
    %cst_24 = arith.constant dense<0.000000e+00> : vector<8x512xf32>
    %106 = tpu.matmul %24, %105, %cst_24 {dimension_numbers = #tpu.dot_dimension_numbers<[1], [0], [0], [1], [0, 0, 1, 1], [], []>} : vector<8x36xf32>, vector<36x512xf32>, vector<8x512xf32> -> vector<8x512xf32>
    %c0_25 = arith.constant 0 : index
    %c0_26 = arith.constant 0 : index
    %107 = vector.load %arg4[%c0_25, %c0_26] : memref<8x1xf32, #tpu.memory_space<vmem>>, vector<8x1xf32>
    %108 = vector.broadcast %107 : vector<8x1xf32> to vector<8x512xf32>
    %109 = arith.addf %106, %108 : vector<8x512xf32>
    %110 = vector.extract_strided_slice %109 {offsets = [0, 0], sizes = [8, 256], strides = [1, 1]} : vector<8x512xf32> to vector<8x256xf32>
    %c0_27 = arith.constant 0 : index
    %c0_28 = arith.constant 0 : index
    %c0_29 = arith.constant 0 : index
    %111 = vector.load %arg5[%c0_27, %c0_28, %c0_29] : memref<2x8x256xf32, #tpu.memory_space<vmem>>, vector<1x8x256xf32>
    %112 = vector.shape_cast %111 : vector<1x8x256xf32> to vector<8x256xf32>
    %113 = vector.shape_cast %110 : vector<8x256xf32> to vector<1x8x256xf32>
    tpu.vector_store %arg5[%c0_27, %c0_28, %c0_29], %113 {strides = array<i32>} : memref<2x8x256xf32, #tpu.memory_space<vmem>>, vector<1x8x256xf32>,
    %114 = vector.extract_strided_slice %109 {offsets = [0, 256], sizes = [8, 256], strides = [1, 1]} : vector<8x512xf32> to vector<8x256xf32>
    %c1_30 = arith.constant 1 : index
    %c0_31 = arith.constant 0 : index
    %c0_32 = arith.constant 0 : index
    %115 = vector.load %arg5[%c1_30, %c0_31, %c0_32] : memref<2x8x256xf32, #tpu.memory_space<vmem>>, vector<1x8x256xf32>
    %116 = vector.shape_cast %115 : vector<1x8x256xf32> to vector<8x256xf32>
    %117 = vector.shape_cast %114 : vector<8x256xf32> to vector<1x8x256xf32>
    tpu.vector_store %arg5[%c1_30, %c0_31, %c0_32], %117 {strides = array<i32>} : memref<2x8x256xf32, #tpu.memory_space<vmem>>, vector<1x8x256xf32>,
    return
  }
  func.func @transform_0(%arg0: i32) -> (i32, i32, i32) {
    %c0_i32 = arith.constant 0 : i32
    %c0_i32_0 = arith.constant 0 : i32
    %c0_i32_1 = arith.constant 0 : i32
    %c0_i32_2 = arith.constant 0 : i32
    return %c0_i32, %c0_i32_0, %c0_i32_1 : i32, i32, i32
  }
  func.func @transform_1(%arg0: i32) -> (i32, i32) {
    %c0_i32 = arith.constant 0 : i32
    %c0_i32_0 = arith.constant 0 : i32
    %c0_i32_1 = arith.constant 0 : i32
    return %c0_i32, %c0_i32_0 : i32, i32
  }
  func.func @transform_2(%arg0: i32) -> (i32, i32) {
    %c0_i32 = arith.constant 0 : i32
    %c0_i32_0 = arith.constant 0 : i32
    %c0_i32_1 = arith.constant 0 : i32
    return %c0_i32, %c0_i32_0 : i32, i32
  }
  func.func @transform_3(%arg0: i32) -> (i32, i32) {
    %c0_i32 = arith.constant 0 : i32
    %c0_i32_0 = arith.constant 0 : i32
    %c0_i32_1 = arith.constant 0 : i32
    return %c0_i32, %c0_i32_0 : i32, i32
  }
  func.func @transform_4(%arg0: i32) -> (i32, i32, i32) {
    %c0_i32 = arith.constant 0 : i32
    %c0_i32_0 = arith.constant 0 : i32
    %c0_i32_1 = arith.constant 0 : i32
    %c0_i32_2 = arith.constant 0 : i32
    return %c0_i32, %c0_i32_0, %c0_i32_1 : i32, i32, i32
  }
  func.func @transform_5(%arg0: i32) -> (i32, i32) {
    %c0_i32 = arith.constant 0 : i32
    %c0_i32_0 = arith.constant 0 : i32
    %c0_i32_1 = arith.constant 0 : i32
    return %c0_i32, %c0_i32_0 : i32, i32
  }
}

</mosaic_0001>

<bundles_post_ra>
// kernel: spectral_norm_conv2d_forward.1
= control target key start
LH: loop header
LB: loop body
LE: loop exit
PB: predicated region body
PF: predicated region fallthrough
CT: control target
= control target key end

     0   :  { %v708_v0 = vmov 0   ;;  %s710_s24 = smov 1   ;;  %s712_s25 = smov 15   ;;  %vm1149_vm0 = vcmask 293888   ;;  %v66_v27 = vlaneseq  ;;  %vm142_vm1 = vcmask 130048   ;;  %s1142_s2 = inlined_call_operand.vmem [shape: f32[8,1], index: 2, kind: input, shape index: {}]   ;;  %s1143_s0 = inlined_call_operand.vmem [shape: f32[2,4,256], index: 0, kind: input, shape index: {}]   ;;  %s1144_s1 = inlined_call_operand.vmem [shape: f32[8,36], index: 1, kind: input, shape index: {}]   ;;  %s1145_s3 = inlined_call_operand.vmem [shape: f32[8,1], index: 3, kind: input, shape index: {}]   ;;  %s1146_s5 = inlined_call_operand.vmem [shape: f32[8,1], index: 5, kind: output, shape index: {1}]   ;;  %s1147_s4 = inlined_call_operand.vmem [shape: f32[2,8,256], index: 4, kind: output, shape index: {0}]  }
   0x1   :  { %630 = vset.pattern.permute.xlu0 %v708_v0  ;;  %v20_v1 = vld [vmem:[%s1142_s2] sm:$0xff]  ;;  %701 = vset.pattern.permute.xlu1 %v708_v0  ;;  %v759_v3 = vld [vmem:[%s1143_s0 + $0x8] sm:$0xff]  ;;  %s709_s2 = smov 16   ;;  %s713_s26 = smov 127   ;;  %vm1148_vm2 = vcmask 7168   ;;  %vm1151_vm4 = vcmask 138240  }
   0x2   :  { %23 = vperm.xlu0 %630, %v20_v1   ;;  %v754_v2 = vld [vmem:[%s1143_s0] sm:$0xff]  ;;  %v763_v4 = vcombine.high %v759_v3, %v759_v3  ;;  %s711_s0 = smov 17   ;;  %s714_s27 = smov 112   ;;  %v67_v28 = vand.u32 127, %v66_v27  ;;  %vm172_vm5 = vcmask 121856   ;;  %vm402_vm10 = vcmask 1043456  }
   0x3   :  { %v767_v5 = vcombine.high %v754_v2, %v754_v2  ;;  %s715_s28 = smov 113   ;;  %v780_v10 = vld [vmem:[%s1144_s1] sm:$0xff]  ;;  %s716_s1 = smov 111   ;;  %vm234_vm13 = vcmask 1039360  }
   0x4   :  { %v631_v6 = vpack.i.bf16 %v754_v2, %v763_v4  ;;  %v676_v9 = vpack.i.bf16 %v763_v4, %v759_v3  ;;  %v68_v30 = vadd.s32 128, %v67_v28  ;;  %v71_v33 = vand.u32 255, %v67_v28 }
   0x5   :  { %v636_v7 = vpack.i.bf16 %v759_v3, %v767_v5  ;;  %v671_v8 = vpack.i.bf16 %v767_v5, %v754_v2  ;;  %v70_v42 = vadd.s32 384, %v67_v28  ;;  %v69_v52 = vadd.s32 256, %v67_v28 }
   0x6   :  { %632 = vrot.lane.b32.xlu1 %v631_v6, %s709_s2  ;;  %v72_v40 = vand.u32 255, %v68_v30  ;;  %v798_v44 = vshra.s32 %v71_v33, 4  ;;  %v811_v51 = vand.u32 15, %v71_v33 }
   0x7   :  { %v74_v57 = vand.u32 255, %v70_v42  ;;  %v73_v0 = vand.u32 255, %v69_v52 }
   0x8   :  { %v809_v50 = vand.u32 15, %v72_v40  ;;  %v819_v56 = vshra.s32 %v72_v40, 4  ;;  %vm83_vm3 = vcmp.ge.s32.totalorder %v798_v44, 1  ;;  %vm1150_vm7 = vcmp.ge.s32.totalorder %v811_v51, 1 }
   0x9   :  { %vm1153_vm11 = vcmp.lt.s32.totalorder %v811_v51, 15  ;;  %vm849_vm12 = vmand %vm83_vm3, %vm1150_vm7 }
   0xa   :  { %637 = vrot.lane.b32.xlu1 %v636_v7, %s709_s2  ;;  %vm92_vm6 = vcmp.ge.s32.totalorder %v809_v50, 1  ;;  %vm84_vm8 = vcmp.ge.s32.totalorder %v819_v56, 1  ;;  %vm1154_vm9 = vcmp.lt.s32.totalorder %v809_v50, 15  ;;  %vm871_vm15 = vmand %vm83_vm3, %vm1153_vm11 }
   0xb   :  { %vm858_vm14 = vmand %vm84_vm8, %vm1154_vm9 }
   0xe   :  { %642 = vrot.lane.b32.xlu1 %v631_v6, %s710_s24 }
  0x12   :  { %647 = vrot.lane.b32.xlu1 %v636_v7, %s710_s24 }
  0x16   :  { %652 = vrot.lane.b32.xlu1 %v631_v6, %s711_s0 }
  0x1a   :  { %662 = vrot.lane.b32.xlu1 %v631_v6, %s712_s25  ;;  %v832_v6 = vand.u32 15, %v74_v57 }
  0x1e   :  { %667 = vrot.lane.b32.xlu1 %v636_v7, %s712_s25 }
  0x22   :  { %672 = vrot.lane.b32.xlu1 %v671_v8, %s713_s26 }
  0x26   :  { %677 = vrot.lane.b32.xlu1 %v676_v9, %s713_s26 }
  0x2a   :  { %682 = vrot.lane.b32.xlu1 %v671_v8, %s714_s27 }
  0x2e   :  { %692 = vrot.lane.b32.xlu1 %v671_v8, %s715_s28  ;;  %v840_v8 = vshra.s32 %v74_v57, 4 }
  0x78   :  { %v633_v22 = vpop.permute.xlu1 %632 }
  0x79   :  { %v635_v31 = vunpack.i.h.bf16 %v633_v22  ;;  %v634_v32 = vunpack.i.l.bf16 %v633_v22  ;;  %v876_v22 = vshra.s32 %v73_v0, 4 }
  0x7b   :  { %v150_v43 = vsel %vm142_vm1, %v634_v32, %v635_v31 }
  0x7c   :  { %v638_v23 = vpop.permute.xlu1 %637  ;;  %v159_v1 = vsel %vm83_vm3, %v150_v43, 0.0 }
  0x7d   :  { %v640_v34 = vunpack.i.h.bf16 %v638_v23  ;;  %v639_v35 = vunpack.i.l.bf16 %v638_v23 }
  0x7f   :  { %v801_v45 = vsel %vm142_vm1, %v640_v34, %v634_v32  ;;  %v143_v46 = vsel %vm142_vm1, %v635_v31, %v639_v35  ;;  %v805_v47 = vsel %vm142_vm1, %v639_v35, %v640_v34  ;;  %vm94_vm1 = vcmp.ge.s32.totalorder %v832_v6, 1 }
  0x80   :  { %v643_v24 = vpop.permute.xlu1 %642  ;;  %v884_v28 = vsel %vm84_vm8, %v143_v46, 0.0 }
  0x81   :  { %v24_v11 = vpop.permute.xlu0 %23  ;;  %v645_v36 = vunpack.i.h.bf16 %v643_v24  ;;  %v644_v37 = vunpack.i.l.bf16 %v643_v24 }
  0x82   :  { %v26_v12 = vmul.f32 %v24_v11, %v780_v10 }
  0x83   :  { %v213_v48 = vsel %vm1148_vm2, %v644_v37, %v645_v36 }
  0x84   :  { %v28_v13 = vsel %vm1149_vm0, %v26_v12, 0.0  ;;  %v648_v25 = vpop.permute.xlu1 %647 }
  0x85   :  { %v29_v14 = vrot.slane %v28_v13, 4  ;;  %v649_v38 = vunpack.i.l.bf16 %v648_v25  ;;  %v650_v41 = vunpack.i.h.bf16 %v648_v25 }
  0x87   :  { %v30_v15 = vadd.f32 %v29_v14, %v28_v13  ;;  %v206_v49 = vsel %vm1148_vm2, %v645_v36, %v649_v38  ;;  %v816_v54 = vsel %vm1148_vm2, %v649_v38, %v650_v41  ;;  %v208_v55 = vsel %vm1148_vm2, %v650_v41, %v644_v37 }
  0x88   :  { %v793_v26 = vpop.permute.xlu1 %652  ;;  %v223_v12 = vsel %vm92_vm6, %v206_v49, 0.0  ;;  %vm86_vm2 = vcmp.ge.s32.totalorder %v840_v8, 1  ;;  %v225_v33 = vsel %vm94_vm1, %v208_v55, 0.0 }
  0x89   :  { %v31_v16 = vrot.slane %v30_v15, 2  ;;  %v655_v58 = vunpack.i.h.bf16 %v793_v26  ;;  %v654_v59 = vunpack.i.l.bf16 %v793_v26  ;;  %v371_v25 = vrot.slane %v223_v12, 4 }
  0x8a   :  { %v162_v46 = vsel %vm86_vm2, %v801_v45, 0.0 }
  0x8b   :  { %v32_v17 = vadd.f32 %v31_v16, %v30_v15  ;;  %v222_v16 = vsel %vm1150_vm7, %v213_v48, 0.0  ;;  %vm298_vm7 = vcmask 916480   ;;  %v373_v48 = vrot.slane %v225_v33, 4 }
  0x8c   :  { %v663_v29 = vpop.permute.xlu1 %662  ;;  %v370_v31 = vrot.slane %v222_v16, 4 }
  0x8d   :  { %v33_v18 = vrot.slane %v32_v17, 1  ;;  %v665_v60 = vunpack.i.h.bf16 %v663_v29  ;;  %v664_v61 = vunpack.i.l.bf16 %v663_v29 }
  0x8f   :  { %v784_v19 = vadd.f32 %v33_v18, %v32_v17  ;;  %v180_v14 = vsel %vm172_vm5, %v664_v61, %v665_v60  ;;  %v358_v17 = vrot.slane %v159_v1, 4 }
  0x90   :  { %v795_v39 = vpop.permute.xlu1 %667  ;;  %v193_v32 = vsel %vm871_vm15, %v180_v14, 0.0 }
  0x91   :  { %v35_v20 = vmul.f32 %v784_v19, %v784_v19  ;;  %v669_v62 = vunpack.i.l.bf16 %v795_v39  ;;  %v670_v63 = vunpack.i.h.bf16 %v795_v39  ;;  %v359_v39 = vrot.slane %v884_v28, 4 }
  0x92   :  { %v918_v43 = vsel %vm402_vm10, %v193_v32, %v370_v31 }
  0x93   :  { %v36_v21 = vsel %vm1149_vm0, %v35_v20, 0.0  ;;  %v173_v11 = vsel %vm172_vm5, %v665_v60, %v669_v62  ;;  %v175_v18 = vsel %vm172_vm5, %v670_v63, %v664_v61  ;;  %v865_v20 = vand.u32 15, %v73_v0 }
  0x94   :  { %37 = vadd.xlane.f32.xlu0 %v36_v21  ;;  %v813_v53 = vpop.permute.xlu1 %672  ;;  %vm1155_vm0 = vcmp.lt.s32.totalorder %v832_v6, 15  ;;  %v194_v29 = vsel %vm858_vm14, %v173_v11, 0.0  ;;  %v174_v37 = vsel %vm172_vm5, %v669_v62, %v670_v63  ;;  %v361_v0 = vrot.slane %v162_v46, 4 }
  0x95   :  { %v675_v23 = vunpack.i.h.bf16 %v813_v53  ;;  %v674_v27 = vunpack.i.l.bf16 %v813_v53  ;;  %vm93_vm3 = vcmp.ge.s32.totalorder %v865_v20, 1  ;;  %vm901_vm14 = vmand %vm86_vm2, %vm1155_vm0  ;;  %vm1152_vm15 = vcmp.lt.s32.totalorder %v865_v20, 15 }
  0x96   :  { %v911_v40 = vsel %vm402_vm10, %v194_v29, %v371_v25  ;;  %v224_v49 = vsel %vm93_vm3, %v816_v54, 0.0  ;;  %v196_v52 = vsel %vm901_vm14, %v175_v18, 0.0  ;;  %vm89_vm14 = vcmp.lt.s32.totalorder %v876_v22, 15 }
  0x97   :  { %v235_v42 = vsel %vm234_vm13, %v674_v27, %v675_v23  ;;  %v372_v1 = vrot.slane %v224_v49, 4 }
  0x98   :  { %v252_v60 = vsel %vm1153_vm11, %v235_v42, 0.0  ;;  %vm90_vm11 = vcmp.lt.s32.totalorder %v840_v8, 15 }
  0x99   :  { %v382_v16 = vrot.slane %v252_v60, 4 }
  0xaa   :  { %657 = vrot.lane.b32.xlu0 %v636_v7, %s711_s0  ;;  %v116_v7 = vsel %vm1151_vm4, %v654_v59, %v655_v58  ;;  %vm264_vm4 = vcmask 924672  }
  0xab   :  { %v129_v30 = vsel %vm849_vm12, %v116_v7, 0.0  ;;  %vm85_vm12 = vcmp.ge.s32.totalorder %v876_v22, 1 }
  0xac   :  { %v914_v41 = vsel %vm402_vm10, %v129_v30, %v358_v17  ;;  %v161_v53 = vsel %vm85_vm12, %v805_v47, 0.0  ;;  %vm935_vm5 = vmand %vm85_vm12, %vm1152_vm15 }
  0xad   :  { %v606_v63 = vpack.c.bf16 %v918_v43, %v914_v41  ;;  %v195_v11 = vsel %vm935_vm5, %v174_v37, 0.0  ;;  %v360_v15 = vrot.slane %v161_v53, 4  ;;  %vm975_vm5 = vmand %vm86_vm2, %vm94_vm1  ;;  %vm88_vm2 = vcmp.lt.s32.totalorder %v819_v56, 15 }
  0xae   :  { %687 = vrot.lane.b32.xlu0 %v676_v9, %s714_s27  ;;  %v409_v30 = vsel %vm402_vm10, %v195_v11, %v372_v1 }
  0xb2   :  { %697 = vrot.lane.b32.xlu0 %v676_v9, %s715_s28  ;;  %v678_v9 = vpop.permute.xlu1 %677 }
  0xb3   :  { %v679_v24 = vunpack.i.l.bf16 %v678_v9  ;;  %v680_v34 = vunpack.i.h.bf16 %v678_v9  ;;  %v410_v9 = vsel %vm402_vm10, %v196_v52, %v373_v48 }
  0xb5   :  { %v236_v38 = vsel %vm234_vm13, %v675_v23, %v679_v24  ;;  %v243_v45 = vsel %vm234_vm13, %v680_v34, %v674_v27  ;;  %v237_v61 = vsel %vm234_vm13, %v679_v24, %v680_v34  ;;  %vm962_vm13 = vmand %vm84_vm8, %vm92_vm6  ;;  %vm87_vm8 = vcmp.lt.s32.totalorder %v798_v44, 15 }
  0xb6   :  { %322 = vrot.lane.b32.xlu0 %v767_v5, %s716_s1  ;;  %v895_v35 = vpop.permute.xlu1 %682  ;;  %v253_v54 = vsel %vm1154_vm9, %v236_v38, 0.0  ;;  %v956_v12 = vsel %vm1155_vm0, %v243_v45, 0.0  ;;  %v968_v17 = vsel %vm1152_vm15, %v237_v61, 0.0  ;;  %vm987_vm15 = vmand %vm85_vm12, %vm93_vm3  ;;  %vm1172_vm12 = vcmask 138240  }
  0xb7   :  { %v685_v47 = vunpack.i.h.bf16 %v895_v35  ;;  %v684_v62 = vunpack.i.l.bf16 %v895_v35  ;;  %v383_v13 = vrot.slane %v253_v54, 4  ;;  %v385_v31 = vrot.slane %v956_v12, 4  ;;  %vm1173_vm9 = vmmov %vm1172_vm12 }
  0xb8   :  { %v384_v32 = vrot.slane %v968_v17, 4  ;;  %vm1174_vm0 = vmmov %vm1173_vm9 }
  0xb9   :  { %v299_v23 = vsel %vm298_vm7, %v684_v62, %v685_v47  ;;  %v998_v33 = vsel %vm402_vm10, %v767_v5, %v383_v13 }
  0xba   :  { %326 = vrot.lane.b32.xlu0 %v763_v4, %s716_s1  ;;  %v949_v7 = vpop.permute.xlu1 %692  ;;  %v316_v37 = vsel %vm87_vm8, %v299_v23, 0.0  ;;  %v413_v21 = vsel %vm402_vm10, %v759_v3, %v384_v32 }
  0xbb   :  { %v695_v24 = vunpack.i.h.bf16 %v949_v7  ;;  %v694_v25 = vunpack.i.l.bf16 %v949_v7 }
 0x121   :  { %v38_v57 = vpop.xlane.xlu0 %37 }
 0x122   :  { %704 = vrsqrt.f32 %v38_v57  ;;  %v394_v57 = vrot.slane %v316_v37, 4 }
 0x125   :  { %v658_v18 = vpop.permute.xlu0 %657 }
 0x126   :  { %v660_v27 = vunpack.i.h.bf16 %v658_v18  ;;  %v659_v28 = vunpack.i.l.bf16 %v658_v18  ;;  %v414_v18 = vsel %vm402_vm10, %v763_v4, %v385_v31 }
 0x128   :  { %v109_v34 = vsel %vm1172_vm12, %v655_v58, %v659_v28  ;;  %v111_v35 = vsel %vm1173_vm9, %v660_v27, %v654_v59  ;;  %v110_v36 = vsel %vm1174_vm0, %v659_v28, %v660_v27  ;;  %v265_v58 = vsel %vm264_vm4, %v694_v25, %v695_v24  ;;  %vm1042_vm9 = vmand %vm89_vm14, %vm93_vm3 }
 0x129   :  { %v130_v38 = vsel %vm962_vm13, %v109_v34, 0.0  ;;  %v132_v5 = vsel %vm975_vm5, %v111_v35, 0.0  ;;  %v131_v41 = vsel %vm987_vm15, %v110_v36, 0.0  ;;  %v688_v42 = vpop.permute.xlu0 %687  ;;  %vm1175_vm12 = vcmp.ge.s32.totalorder %v811_v51, 1  ;;  %vm275_vm3 = vmand %vm88_vm2, %vm92_vm6 }
 0x12a   :  { %vm1020_vm0 = vmand %vm87_vm8, %vm1175_vm12  ;;  %v404_v59 = vsel %vm402_vm10, %v130_v38, %v359_v39  ;;  %v406_v43 = vsel %vm402_vm10, %v132_v5, %v361_v0  ;;  %v405_v46 = vsel %vm402_vm10, %v131_v41, %v360_v15  ;;  %v690_v48 = vunpack.i.h.bf16 %v688_v42  ;;  %v419_v38 = vld [vmem:[%s1145_s3] sm:$0xff] }
 0x12b   :  { %v604_v49 = vpack.c.bf16 %v911_v40, %v404_v59  ;;  %v612_v52 = vpack.c.bf16 %v410_v9, %v406_v43  ;;  %v614_v53 = vpack.c.bf16 %v409_v30, %v405_v46  ;;  %v689_v55 = vunpack.i.l.bf16 %v688_v42 }
 0x12c   :  { %v705_v45 = vpop.eup %704  ;;  %v307_v54 = vsel %vm298_vm7, %v690_v48, %v684_v62  ;;  %v286_v60 = vsel %vm1020_vm0, %v265_v58, 0.0  ;;  %v411_v39 = vsel %vm402_vm10, %v754_v2, %v382_v16  ;;  %vm1183_vm6 = vcmp.lt.s32.totalorder %v832_v6, 15 }
 0x12d   :  { %v40_v61 = vmul.f32 %v705_v45, %v784_v19  ;;  %605 = vmatprep.subr.bf16.mxu0 %v604_v49  ;;  %613 = vmatprep.subr.bf16.mxu1 %v612_v52  ;;  %v301_v0 = vsel %vm298_vm7, %v689_v55, %v690_v48  ;;  %v300_v40 = vsel %vm298_vm7, %v685_v47, %v689_v55  ;;  %v319_v1 = vsel %vm90_vm11, %v307_v54, 0.0  ;;  %v698_v7 = vpop.permute.xlu0 %697  ;;  %vm1054_vm7 = vmand %vm90_vm11, %vm94_vm1 }
 0x12e   :  { %607 = vmatpush1.bf16.msra.mxu0 %v606_v63  ;;  %615 = vmatpush1.bf16.msra.mxu1 %v614_v53  ;;  %v318_v19 = vsel %vm89_vm14, %v301_v0, 0.0  ;;  %v317_v47 = vsel %vm88_vm2, %v300_v40, 0.0  ;;  %v397_v9 = vrot.slane %v319_v1, 4  ;;  %v700_v11 = vunpack.i.h.bf16 %v698_v7  ;;  %vm341_vm15 = vmand %vm90_vm11, %vm1183_vm6 }
 0x12f   :  { %v41_v13 = vmul.f32 %v40_v61, %v780_v10  ;;  %v396_v63 = vrot.slane %v318_v19, 4  ;;  %v395_v14 = vrot.slane %v317_v47, 4  ;;  %v699_v15 = vunpack.i.l.bf16 %v698_v7 }
 0x130   :  { %v273_v16 = vsel %vm264_vm4, %v700_v11, %v694_v25  ;;  %v415_v17 = vsel %vm402_vm10, %v286_v60, %v394_v57  ;;  %vm1182_vm1 = vcmask 293888   ;;  %vm1184_vm13 = vcmp.lt.s32.totalorder %v809_v50, 15 }
 0x131   :  { %v42_v23 = vsel %vm1182_vm1, %v41_v13, 0.0  ;;  %v267_v27 = vsel %vm264_vm4, %v699_v15, %v700_v11  ;;  %v266_v28 = vsel %vm264_vm4, %v695_v24, %v699_v15  ;;  %v289_v29 = vsel %vm1054_vm7, %v273_v16, 0.0  ;;  %vm1095_vm5 = vmand %vm88_vm2, %vm1184_vm13 }
 0x132   :  { %43 = vadd.xlane.f32.xlu1 %v42_v23  ;;  %v287_v30 = vsel %vm275_vm3, %v266_v28, 0.0  ;;  %v418_v25 = vsel %vm402_vm10, %v289_v29, %v397_v9  ;;  %v288_v34 = vsel %vm1042_vm9, %v267_v27, 0.0  ;;  %v610_v31 = vpack.c.bf16 %v415_v17, %v411_v39  ;;  %vm1193_vm9 = vmmov %vm1182_vm1 }
 0x133   :  { %v416_v4 = vsel %vm402_vm10, %v287_v30, %v395_v14  ;;  %v616_v32 = vpack.c.bf16 %v418_v25, %v414_v18  ;;  %v417_v35 = vsel %vm402_vm10, %v288_v34, %v396_v63  ;;  %v717_v24 = vmov 0.0  }
 0x134   :  { %v608_v36 = vpack.c.bf16 %v416_v4, %v998_v33  ;;  %v618_v37 = vpack.c.bf16 %v417_v35, %v413_v21  ;;  %504 = vmatprep.mubr.f32.mxu0 %v717_v24  ;;  %575 = vmatprep.mubr.f32.mxu1 %v717_v24  ;;  %v323_v33 = vpop.permute.xlu0 %322  ;;  %vm328_vm4 = vcmask 908288   ;;  %vm1187_vm12 = vcmp.lt.s32.totalorder %v811_v51, 15 }
 0x135   :  { %617 = vmatprep.subr.bf16.mxu1 %v616_v32  ;;  %vm1104_vm0 = vmand %vm87_vm8, %vm1187_vm12  ;;  %vm1190_vm11 = vcmp.lt.s32.totalorder %v865_v20, 15 }
 0x136   :  { %609 = vmatprep.subr.bf16.mxu0 %v608_v36  ;;  %619 = vmatpush1.bf16.msra.mxu1 %v618_v37  ;;  %vm340_vm2 = vmand %vm89_vm14, %vm1190_vm11  ;;  %vm1191_vm14 = vcmask 7168  }
 0x137   :  { %611 = vmatpush1.bf16.msra.mxu0 %v610_v31  ;;  %vm1192_vm8 = vmmov %vm1182_vm1 }
 0x138   :  { %v327_v42 = vpop.permute.xlu0 %326 }
 0x143   :  { %320 = vrot.lane.b32.xlu1 %v754_v2, %s716_s1 }
 0x147   :  { %324 = vrot.lane.b32.xlu1 %v759_v3, %s716_s1 }
 0x14b   :  { %422 = vperm.xlu1 %701, %v419_v38  }
 0x1bf   :  { %v44_v5 = vpop.xlane.xlu1 %43 }
 0x1c0   :  { %v45_v41 = vmul.f32 %v44_v5, %v44_v5 }
 0x1c2   :  { %v46_v58 = vrot.slane %v45_v41, 4 }
 0x1c3   :  { %v321_v2 = vpop.permute.xlu1 %320 }
 0x1c4   :  { %v47_v3 = vadd.f32 %v46_v58, %v45_v41  ;;  %v337_v59 = vsel %vm328_vm4, %v327_v42, %v321_v2  ;;  %v329_v8 = vsel %vm328_vm4, %v321_v2, %v323_v33 }
 0x1c5   :  { %v353_v43 = vsel %vm341_vm15, %v337_v59, 0.0  ;;  %v350_v44 = vsel %vm1104_vm0, %v329_v8, 0.0 }
 0x1c6   :  { %v48_v50 = vrot.slane %v47_v3, 2  ;;  %599 = vmatprep.subr.msk.mxu1 %vm402_vm10, %v353_v43 }
 0x1c7   :  { %v325_v56 = vpop.permute.xlu1 %324 }
 0x1c8   :  { %v49_v46 = vadd.f32 %v48_v50, %v47_v3  ;;  %v330_v51 = vsel %vm328_vm4, %v323_v33, %v325_v56  ;;  %v331_v48 = vsel %vm328_vm4, %v325_v56, %v327_v42 }
 0x1c9   :  { %v351_v49 = vsel %vm1095_vm5, %v330_v51, 0.0  ;;  %v352_v52 = vsel %vm340_vm2, %v331_v48, 0.0 }
 0x1ca   :  { %v50_v53 = vrot.slane %v49_v46, 1  ;;  %596 = vmatprep.subr.msk.mxu0 %vm402_vm10, %v351_v49  ;;  %600 = vmatpush1.msk.msra.mxu1 %vm402_vm10, %v352_v52 }
 0x1cb   :  { %597 = vmatpush1.msk.msra.mxu0 %vm402_vm10, %v350_v44  ;;  %v423_v54 = vpop.permute.xlu1 %422 }
 0x1cc   :  { %v51_v20 = vadd.f32 %v50_v53, %v49_v46 }
 0x1ce   :  { %706 = vrsqrt.f32 %v51_v20 }
 0x1d8   :  { %v707_v22 = vpop.eup %706 }
 0x1d9   :  { %v53_v55 = vmul.f32 %v707_v22, %v44_v5  ;;  %v56_v45 = vmul.f32 %v707_v22, %v780_v10 }
 0x1db   :  { %55 = vst.msk [vmem:[%s1146_s5] sm:$0xff] %vm1191_vm14, %v53_v55  ;;  %598 = vmatmul.mubr.msk.f32.vlgmr.msra.gmra.mrb[0].mxu0 %vm1192_vm8, %v56_v45  ;;  %601 = vmatmul.mubr.msk.f32.vlgmr.msra.gmra.mrb[0].mxu1 %vm1193_vm9, %v56_v45 }
 0x2ae   :  { %v506_v57 = vpop.f32.mrb[0].mxu0  ;;  %v577_v60 = vpop.f32.mrb[0].mxu1 }
 0x2af   :  { %v507_v39 = vadd.f32 %v506_v57, %v423_v54  ;;  %v578_v61 = vadd.f32 %v577_v60, %v423_v54  ;;  %v508_v0 = vpop.f32.mrb[1].mxu0  ;;  %v579_v40 = vpop.f32.mrb[1].mxu1 }
 0x2b0   :  { %v509_v1 = vadd.f32 %v508_v0, %v423_v54  ;;  %v580_v7 = vadd.f32 %v579_v40, %v423_v54 }
 0x2b1   :  { %582 = vst [vmem:[%s1147_s4] sm:$0xff] %v507_v39  ;;  %602 = vst [vmem:[%s1147_s4 + $0x10] sm:$0xff] %v578_v61 }
 0x2b2   :  { %583 = vst [vmem:[%s1147_s4 + $0x8] sm:$0xff] %v509_v1  ;;  %603 = vst [vmem:[%s1147_s4 + $0x18] sm:$0xff] %v580_v7 }

</bundles_post_ra>
